<compile_context>
chip_gen: v7x
topology: tpu7x:2x2x1
jax: 0.10.0
libtpu: 0.0.40
codegen_flags: <defaults>
</compile_context>

<pallas_src>
import functools

import jax
import jax.numpy as jnp
from jax.experimental import pallas as pl
from jax.experimental.pallas import tpu as pltpu


def _round_up(x: int, m: int) -> int:
    return ((x + m - 1) // m) * m


def _mlp_kernel(x_ref, w1_ref, b1_ref, w2_ref, b2_ref, w3_ref, b3_ref, o_ref):
    """Fused 3-layer MLP for one (TB, Dp) batch tile.

    x_ref:  (TB, Dp)   bf16
    w1_ref: (Dp, H1)   bf16     b1_ref: (1, H1)  f32
    w2_ref: (H1, H2)   bf16     b2_ref: (1, H2)  f32
    w3_ref: (H2, Cp)   bf16     b3_ref: (1, Cp)  f32
    o_ref:  (TB, Cp)   f32
    """
    x = x_ref[...]

    # Layer 1: Linear + ReLU (f32 accumulate, f32 elementwise).
    h1 = jnp.dot(x, w1_ref[...], preferred_element_type=jnp.float32)
    h1 = jnp.maximum(h1 + b1_ref[...], 0.0)
    h1 = h1.astype(jnp.bfloat16)

    # Layer 2: Linear + ReLU.
    h2 = jnp.dot(h1, w2_ref[...], preferred_element_type=jnp.float32)
    h2 = jnp.maximum(h2 + b2_ref[...], 0.0)
    h2 = h2.astype(jnp.bfloat16)

    # Layer 3: Linear (no activation).
    h3 = jnp.dot(h2, w3_ref[...], preferred_element_type=jnp.float32)
    o_ref[...] = h3 + b3_ref[...]


@functools.partial(jax.jit, static_argnames=("num_classes",))
def mlp_forward(x_nchw, w1, b1, w2, b2, w3, b3, *, num_classes=10):
    """Run the MLP forward pass.

    Args:
      x_nchw: (B, C, H, W) input, any float dtype.
      w1: (D, H1), b1: (H1,)   -- D = C*H*W
      w2: (H1, H2), b2: (H2,)
      w3: (H2, num_classes), b3: (num_classes,)
        (weights are (in, out), i.e. torch nn.Linear weight transposed)

    Returns:
      (B, num_classes) float32 logits.
    """
    B = x_nchw.shape[0]
    D = x_nchw.shape[1] * x_nchw.shape[2] * x_nchw.shape[3]
    H1 = w1.shape[1]
    H2 = w2.shape[1]

    # ---- Flatten (== nn.Flatten(start_dim=1)) and pad feature dim to 128. ----
    x = x_nchw.reshape(B, D)
    Dp = _round_up(D, 128)

    # ---- Batch tile: multiple of 8 sublanes, capped for VMEM friendliness. ----
    TB = min(256, _round_up(B, 8))
    Bp = _round_up(B, TB)

    x = jnp.pad(x, ((0, Bp - B), (0, Dp - D))).astype(jnp.bfloat16)

    # ---- Pad classes to a full 128-lane output (lane-dense stores). ----
    Cp = _round_up(num_classes, 128)

    w1p = jnp.pad(w1, ((0, Dp - D), (0, 0))).astype(jnp.bfloat16)        # (Dp, H1)
    w2p = w2.astype(jnp.bfloat16)                                         # (H1, H2)
    w3p = jnp.pad(w3, ((0, 0), (0, Cp - num_classes))).astype(jnp.bfloat16)  # (H2, Cp)

    b1p = b1.reshape(1, H1).astype(jnp.float32)
    b2p = b2.reshape(1, H2).astype(jnp.float32)
    b3p = jnp.pad(b3, (0, Cp - num_classes)).reshape(1, Cp).astype(jnp.float32)

    grid = (Bp // TB,)

    out = pl.pallas_call(
        _mlp_kernel,
        out_shape=jax.ShapeDtypeStruct((Bp, Cp), jnp.float32),
        grid=grid,
        in_specs=[
            # Activation stream: one (TB, Dp) tile per grid step.
            pl.BlockSpec((TB, Dp), lambda i: (i, 0)),
            # Weights / biases: constant block index -> stay resident in VMEM.
            pl.BlockSpec((Dp, H1), lambda i: (0, 0)),
            pl.BlockSpec((1, H1), lambda i: (0, 0)),
            pl.BlockSpec((H1, H2), lambda i: (0, 0)),
            pl.BlockSpec((1, H2), lambda i: (0, 0)),
            pl.BlockSpec((H2, Cp), lambda i: (0, 0)),
            pl.BlockSpec((1, Cp), lambda i: (0, 0)),
        ],
        out_specs=pl.BlockSpec((TB, Cp), lambda i: (i, 0)),
        compiler_params=pltpu.CompilerParams(
            dimension_semantics=("parallel",),
            vmem_limit_bytes=64 * 1024 * 1024,
        ),
    )(x, w1p, b1p, w2p, b2p, w3p, b3p)

    # Slice away batch and class padding.
    return out[:B, :num_classes]


def _reference_forward(x_nchw, w1, b1, w2, b2, w3, b3):
    """Pure-JAX reference with the same bf16-input / f32-accumulate recipe."""
    B = x_nchw.shape[0]
    x = x_nchw.reshape(B, -1).astype(jnp.bfloat16)
    h1 = jnp.dot(x, w1.astype(jnp.bfloat16), preferred_element_type=jnp.float32)
    h1 = jnp.maximum(h1 + b1.astype(jnp.float32), 0.0).astype(jnp.bfloat16)
    h2 = jnp.dot(h1, w2.astype(jnp.bfloat16), preferred_element_type=jnp.float32)
    h2 = jnp.maximum(h2 + b2.astype(jnp.float32), 0.0).astype(jnp.bfloat16)
    h3 = jnp.dot(h2, w3.astype(jnp.bfloat16), preferred_element_type=jnp.float32)
    return h3 + b3.astype(jnp.float32)


if __name__ == "__main__":
    # Small deterministic example matching the module defaults:
    # num_channels=1, img 28x28, hidden_dims=(256, 128), num_classes=10.
    B, C, H, W = 2, 1, 28, 28
    D = C * H * W          # 784
    H1, H2, NC = 256, 128, 10

    key = jax.random.PRNGKey(0)
    kx, k1, k2, k3, kb1, kb2, kb3 = jax.random.split(key, 7)

    x = jax.random.normal(kx, (B, C, H, W), dtype=jnp.float32)

    # Weights stored as (in, out) = torch nn.Linear weight transposed.
    w1 = jax.random.normal(k1, (D, H1), dtype=jnp.float32) * (1.0 / D ** 0.5)
    b1 = jax.random.normal(kb1, (H1,), dtype=jnp.float32) * 0.01
    w2 = jax.random.normal(k2, (H1, H2), dtype=jnp.float32) * (1.0 / H1 ** 0.5)
    b2 = jax.random.normal(kb2, (H2,), dtype=jnp.float32) * 0.01
    w3 = jax.random.normal(k3, (H2, NC), dtype=jnp.float32) * (1.0 / H2 ** 0.5)
    b3 = jax.random.normal(kb3, (NC,), dtype=jnp.float32) * 0.01

    out = mlp_forward(x, w1, b1, w2, b2, w3, b3, num_classes=NC)
    out = jax.block_until_ready(out)

    ref = _reference_forward(x, w1, b1, w2, b2, w3, b3)
    assert out.shape == (B, NC), out.shape
    assert jnp.allclose(out, ref, atol=5e-2, rtol=5e-2), (
        f"max abs diff {jnp.max(jnp.abs(out - ref))}")

    print("KERNEL_OK")
</pallas_src>

<mosaic_0001>
module attributes {stable_mosaic.version = 11 : i64} {
  func.func @_mlp_kernel(%arg0: i32, %arg1: memref<8x896xbf16, #tpu.memory_space<vmem>>, %arg2: memref<896x256xbf16, #tpu.memory_space<vmem>>, %arg3: memref<1x256xf32, #tpu.memory_space<vmem>>, %arg4: memref<256x128xbf16, #tpu.memory_space<vmem>>, %arg5: memref<1x128xf32, #tpu.memory_space<vmem>>, %arg6: memref<128x128xbf16, #tpu.memory_space<vmem>>, %arg7: memref<1x128xf32, #tpu.memory_space<vmem>>, %arg8: memref<8x128xf32, #tpu.memory_space<vmem>>) attributes {dimension_semantics = [#tpu.dimension_semantics<parallel>], iteration_bounds = array<i64: 1>, scalar_prefetch = 0 : i64, scratch_operands = 0 : i64, tpu.core_type = #tpu.core_type<tc>, window_params = [{transform_indices = @transform_0, window_bounds = array<i64: 8, 896>}, {pipeline_mode = #tpu.pipeline_mode<synchronous>, transform_indices = @transform_1, window_bounds = array<i64: 896, 256>}, {pipeline_mode = #tpu.pipeline_mode<synchronous>, transform_indices = @transform_2, window_bounds = array<i64: 1, 256>}, {pipeline_mode = #tpu.pipeline_mode<synchronous>, transform_indices = @transform_3, window_bounds = array<i64: 256, 128>}, {pipeline_mode = #tpu.pipeline_mode<synchronous>, transform_indices = @transform_4, window_bounds = array<i64: 1, 128>}, {pipeline_mode = #tpu.pipeline_mode<synchronous>, transform_indices = @transform_5, window_bounds = array<i64: 128, 128>}, {pipeline_mode = #tpu.pipeline_mode<synchronous>, transform_indices = @transform_6, window_bounds = array<i64: 1, 128>}, {transform_indices = @transform_7, window_bounds = array<i64: 8, 128>}]} {
    %c0 = arith.constant 0 : index
    %c0_0 = arith.constant 0 : index
    %0 = vector.load %arg1[%c0, %c0_0] : memref<8x896xbf16, #tpu.memory_space<vmem>>, vector<8x896xbf16>
    %c0_1 = arith.constant 0 : index
    %c0_2 = arith.constant 0 : index
    %1 = vector.load %arg2[%c0_1, %c0_2] : memref<896x256xbf16, #tpu.memory_space<vmem>>, vector<896x256xbf16>
    %cst = arith.constant dense<0.000000e+00> : vector<8x256xf32>
    %2 = tpu.matmul %0, %1, %cst {dimension_numbers = #tpu.dot_dimension_numbers<[1], [0], [0], [1], [0, 0, 1, 1], [], []>} : vector<8x896xbf16>, vector<896x256xbf16>, vector<8x256xf32> -> vector<8x256xf32>
    %c0_3 = arith.constant 0 : index
    %c0_4 = arith.constant 0 : index
    %3 = vector.load %arg3[%c0_3, %c0_4] : memref<1x256xf32, #tpu.memory_space<vmem>>, vector<1x256xf32>
    %4 = vector.broadcast %3 : vector<1x256xf32> to vector<8x256xf32>
    %5 = arith.addf %2, %4 : vector<8x256xf32>
    %cst_5 = arith.constant 0.000000e+00 : f32
    %6 = vector.broadcast %cst_5 : f32 to vector<8x256xf32>
    %7 = arith.maximumf %5, %6 : vector<8x256xf32>
    %8 = arith.truncf %7 : vector<8x256xf32> to vector<8x256xbf16>
    %c0_6 = arith.constant 0 : index
    %c0_7 = arith.constant 0 : index
    %9 = vector.load %arg4[%c0_6, %c0_7] : memref<256x128xbf16, #tpu.memory_space<vmem>>, vector<256x128xbf16>
    %cst_8 = arith.constant dense<0.000000e+00> : vector<8x128xf32>
    %10 = tpu.matmul %8, %9, %cst_8 {dimension_numbers = #tpu.dot_dimension_numbers<[1], [0], [0], [1], [0, 0, 1, 1], [], []>} : vector<8x256xbf16>, vector<256x128xbf16>, vector<8x128xf32> -> vector<8x128xf32>
    %c0_9 = arith.constant 0 : index
    %c0_10 = arith.constant 0 : index
    %11 = vector.load %arg5[%c0_9, %c0_10] : memref<1x128xf32, #tpu.memory_space<vmem>>, vector<1x128xf32>
    %12 = vector.broadcast %11 : vector<1x128xf32> to vector<8x128xf32>
    %13 = arith.addf %10, %12 : vector<8x128xf32>
    %cst_11 = arith.constant 0.000000e+00 : f32
    %14 = vector.broadcast %cst_11 : f32 to vector<8x128xf32>
    %15 = arith.maximumf %13, %14 : vector<8x128xf32>
    %16 = arith.truncf %15 : vector<8x128xf32> to vector<8x128xbf16>
    %c0_12 = arith.constant 0 : index
    %c0_13 = arith.constant 0 : index
    %17 = vector.load %arg6[%c0_12, %c0_13] : memref<128x128xbf16, #tpu.memory_space<vmem>>, vector<128x128xbf16>
    %cst_14 = arith.constant dense<0.000000e+00> : vector<8x128xf32>
    %18 = tpu.matmul %16, %17, %cst_14 {dimension_numbers = #tpu.dot_dimension_numbers<[1], [0], [0], [1], [0, 0, 1, 1], [], []>} : vector<8x128xbf16>, vector<128x128xbf16>, vector<8x128xf32> -> vector<8x128xf32>
    %c0_15 = arith.constant 0 : index
    %c0_16 = arith.constant 0 : index
    %19 = vector.load %arg7[%c0_15, %c0_16] : memref<1x128xf32, #tpu.memory_space<vmem>>, vector<1x128xf32>
    %20 = vector.broadcast %19 : vector<1x128xf32> to vector<8x128xf32>
    %21 = arith.addf %18, %20 : vector<8x128xf32>
    %c0_17 = arith.constant 0 : index
    %c0_18 = arith.constant 0 : index
    %22 = vector.load %arg8[%c0_17, %c0_18] : memref<8x128xf32, #tpu.memory_space<vmem>>, vector<8x128xf32>
    tpu.vector_store %arg8[%c0_17, %c0_18], %21 {strides = array<i32>} : memref<8x128xf32, #tpu.memory_space<vmem>>, vector<8x128xf32>,
    return
  }
  func.func @transform_0(%arg0: i32) -> (i32, i32) {
    %c0_i32 = arith.constant 0 : i32
    %c0_i32_0 = arith.constant 0 : i32
    return %arg0, %c0_i32 : i32, i32
  }
  func.func @transform_1(%arg0: i32) -> (i32, i32) {
    %c0_i32 = arith.constant 0 : i32
    %c0_i32_0 = arith.constant 0 : i32
    %c0_i32_1 = arith.constant 0 : i32
    return %c0_i32, %c0_i32_0 : i32, i32
  }
  func.func @transform_2(%arg0: i32) -> (i32, i32) {
    %c0_i32 = arith.constant 0 : i32
    %c0_i32_0 = arith.constant 0 : i32
    %c0_i32_1 = arith.constant 0 : i32
    return %c0_i32, %c0_i32_0 : i32, i32
  }
  func.func @transform_3(%arg0: i32) -> (i32, i32) {
    %c0_i32 = arith.constant 0 : i32
    %c0_i32_0 = arith.constant 0 : i32
    %c0_i32_1 = arith.constant 0 : i32
    return %c0_i32, %c0_i32_0 : i32, i32
  }
  func.func @transform_4(%arg0: i32) -> (i32, i32) {
    %c0_i32 = arith.constant 0 : i32
    %c0_i32_0 = arith.constant 0 : i32
    %c0_i32_1 = arith.constant 0 : i32
    return %c0_i32, %c0_i32_0 : i32, i32
  }
  func.func @transform_5(%arg0: i32) -> (i32, i32) {
    %c0_i32 = arith.constant 0 : i32
    %c0_i32_0 = arith.constant 0 : i32
    %c0_i32_1 = arith.constant 0 : i32
    return %c0_i32, %c0_i32_0 : i32, i32
  }
  func.func @transform_6(%arg0: i32) -> (i32, i32) {
    %c0_i32 = arith.constant 0 : i32
    %c0_i32_0 = arith.constant 0 : i32
    %c0_i32_1 = arith.constant 0 : i32
    return %c0_i32, %c0_i32_0 : i32, i32
  }
  func.func @transform_7(%arg0: i32) -> (i32, i32) {
    %c0_i32 = arith.constant 0 : i32
    %c0_i32_0 = arith.constant 0 : i32
    return %arg0, %c0_i32 : i32, i32
  }
}

</mosaic_0001>

<bundles_post_ra>
// kernel: mlp_forward.1
= control target key start
LH: loop header
LB: loop body
LE: loop exit
PB: predicated region body
PF: predicated region fallthrough
CT: control target
= control target key end

     0   :  { %12 = vsyncpa [#allocation3], 0  ;;  %s2074_s0 = inlined_call_operand.hbm [shape: bf16[8,896], index: 0, kind: input, shape index: {}]   ;;  %s2075_s1 = inlined_call_operand.hbm [shape: bf16[896,256], index: 1, kind: input, shape index: {}]   ;;  %s2076_s2 = inlined_call_operand.hbm [shape: f32[1,256], index: 2, kind: input, shape index: {}]   ;;  %s2077_s3 = inlined_call_operand.hbm [shape: bf16[256,128], index: 3, kind: input, shape index: {}]   ;;  %s2078_s4 = inlined_call_operand.hbm [shape: f32[1,128], index: 4, kind: input, shape index: {}]   ;;  %s2079_s5 = inlined_call_operand.hbm [shape: bf16[128,128], index: 5, kind: input, shape index: {}]   ;;  %s2080_s6 = inlined_call_operand.hbm [shape: f32[1,128], index: 6, kind: input, shape index: {}]   ;;  %s2081_s7 = inlined_call_operand.hbm [shape: f32[8,128], index: 7, kind: output, shape index: {}]  }
   0x1   :  { %13 = vsyncpa [#allocation6], 0 }
   0x2   :  { %14 = vsyncpa [#allocation9], 0 }
   0x3   :  { %15 = vsyncpa [#allocation12], 0 }
   0x4   :  { %16 = vsyncpa [#allocation4], 0  ;;  %s1911_s24 = smov [#allocation5]   ;;  %s1725_s28 = scalar_lea.hbm %s2075_s1, 14336 }
   0x5   :  { %s32_s25 = sshll.u32 %s1911_s24, 4  ;;  %p1726_p0 = scmp.ne.s32.totalorder %s2075_s1, %s1725_s28  ;;  %s33_s25 = int_to_ptr.vmem [resolvable:$true] %s32_s25 }
   0x6   :  { %p1729_p1 = scmp.lt.u32.totalorder %s1725_s28, %s2075_s1 }
   0x8   :  { %p1731_p2 = pnand %p1729_p1, %p1726_p0 }
   0xa   :  { %1734 = shalt.err (!%p1731_p2)
}
   0xb   :  { %s1735_s10 = scalar_lea.vmem %s33_s25, 14336  ;;  %p1740_p4 = scmp.lt.s32.totalorder %s33_s25, %s33_s25 }
   0xc   :  { %p1736_p3 = scmp.ne.s32.totalorder %s33_s25, %s1735_s10  ;;  %p1741_p5 = scmp.lt.s32.totalorder %s1735_s10, %s1735_s10 }
   0xe   :  { %p1742_p6 = por %p1741_p5, %p1740_p4 }
  0x10   :  { %p1743_p7 = pnand %p1742_p6, %p1736_p3 }
  0x12   :  { %1746 = shalt.err (!%p1743_p7)
}
  0x13   :  { %s1912_s11 = smov 128   ;;  %s1913_s12 = smov 8  }
  0x14   :  { %38 = dma.hbm_to_vmem [thread:$0]  %s2075_s1, 14336, %s33_s25, [#allocation6], %s1912_s11, %s1912_s11, %s1913_s12  }
  0x15   :  { %s1914_s15 = smov [#allocation8]   ;;  %s1747_s19 = scalar_lea.hbm %s2077_s3, 2048 }
  0x16   :  { %s54_s16 = sshll.u32 %s1914_s15, 4  ;;  %p1748_p8 = scmp.ne.s32.totalorder %s2077_s3, %s1747_s19  ;;  %s55_s16 = int_to_ptr.vmem [resolvable:$true] %s54_s16 }
  0x17   :  { %p1751_p9 = scmp.lt.u32.totalorder %s1747_s19, %s2077_s3 }
  0x19   :  { %p1753_p10 = pnand %p1751_p9, %p1748_p8 }
  0x1b   :  { %1756 = shalt.err (!%p1753_p10)
}
  0x1c   :  { %s1757_s24 = scalar_lea.vmem %s55_s16, 2048  ;;  %p1762_p12 = scmp.lt.s32.totalorder %s55_s16, %s55_s16 }
  0x1d   :  { %p1758_p11 = scmp.ne.s32.totalorder %s55_s16, %s1757_s24  ;;  %p1763_p13 = scmp.lt.s32.totalorder %s1757_s24, %s1757_s24 }
  0x1f   :  { %p1764_p0 = por %p1763_p13, %p1762_p12 }
  0x21   :  { %p1765_p1 = pnand %p1764_p0, %p1758_p11 }
  0x23   :  { %1768 = shalt.err (!%p1765_p1)
}
  0x24   :  { %s1915_s1 = smov 64   ;;  %s1916_s25 = smov 4  }
  0x25   :  { %60 = dma.hbm_to_vmem [thread:$0]  %s2077_s3, 2048, %s55_s16, [#allocation9], %s1915_s1, %s1915_s1, %s1916_s25  }
  0x26   :  { %s1917_s28 = smov [#allocation11]   ;;  %s1918_s30 = smov [#allocation2]  }
  0x27   :  { %s76_s29 = sshll.u32 %s1917_s28, 4  ;;  %s23_s8 = sshll.u32 %s1918_s30, 4  ;;  %s77_s29 = int_to_ptr.vmem [resolvable:$true] %s76_s29  ;;  %s24_s8 = int_to_ptr.vmem [resolvable:$true] %s23_s8 }
  0x28   :  { %s1769_s11 = scalar_lea.hbm %s2079_s5, 1024 }
  0x29   :  { %p1770_p2 = scmp.ne.s32.totalorder %s2079_s5, %s1769_s11  ;;  %p1773_p3 = scmp.lt.u32.totalorder %s1769_s11, %s2079_s5 }
  0x2b   :  { %p1775_p4 = pnand %p1773_p3, %p1770_p2 }
  0x2d   :  { %1778 = shalt.err (!%p1775_p4)
}
  0x2e   :  { %s1779_s3 = scalar_lea.vmem %s77_s29, 1024  ;;  %p1784_p6 = scmp.lt.s32.totalorder %s77_s29, %s77_s29 }
  0x2f   :  { %p1780_p5 = scmp.ne.s32.totalorder %s77_s29, %s1779_s3  ;;  %p1785_p7 = scmp.lt.s32.totalorder %s1779_s3, %s1779_s3 }
  0x31   :  { %p1786_p8 = por %p1785_p7, %p1784_p6 }
  0x33   :  { %p1787_p9 = pnand %p1786_p8, %p1780_p5 }
  0x35   :  { %1790 = shalt.err (!%p1787_p9)
}
  0x36   :  { %82 = dma.hbm_to_vmem [thread:$0]  %s2079_s5, 1024, %s77_s29, [#allocation12], %s1915_s1, %s1915_s1, %s1916_s25  }
  0x37   :  { %s1791_s20 = scalar_lea.hbm %s2074_s0, 448 }
  0x38   :  { %p1792_p10 = scmp.ne.s32.totalorder %s2074_s0, %s1791_s20  ;;  %p1795_p11 = scmp.lt.u32.totalorder %s1791_s20, %s2074_s0 }
  0x3a   :  { %p1797_p12 = pnand %p1795_p11, %p1792_p10 }
  0x3c   :  { %1800 = shalt.err (!%p1797_p12)
}
  0x3d   :  { %s1801_s26 = scalar_lea.vmem %s24_s8, 448  ;;  %p1806_p0 = scmp.lt.s32.totalorder %s24_s8, %s24_s8 }
  0x3e   :  { %p1802_p13 = scmp.ne.s32.totalorder %s24_s8, %s1801_s26  ;;  %p1807_p1 = scmp.lt.s32.totalorder %s1801_s26, %s1801_s26 }
  0x40   :  { %p1808_p2 = por %p1807_p1, %p1806_p0 }
  0x42   :  { %p1809_p3 = pnand %p1808_p2, %p1802_p13 }
  0x44   :  { %1812 = shalt.err (!%p1809_p3)
}
  0x45   :  { %26 = dma.hbm_to_vmem [thread:$0]  %s2074_s0, 448, %s24_s8, [#allocation3]  }
  0x46   :  { %s1919_s25 = smov [#allocation7]   ;;  %s1920_s28 = smov [#allocation10]  }
  0x47   :  { %s45_s27 = sshll.u32 %s1919_s25, 4  ;;  %s67_s29 = sshll.u32 %s1920_s28, 4  ;;  %s46_s27 = int_to_ptr.vmem [resolvable:$true] %s45_s27  ;;  %s68_s29 = int_to_ptr.vmem [resolvable:$true] %s67_s29 }
  0x48   :  { %s1813_s10 = scalar_lea.hbm %s2076_s2, 32 }
  0x49   :  { %p1814_p4 = scmp.ne.s32.totalorder %s2076_s2, %s1813_s10  ;;  %p1817_p5 = scmp.lt.u32.totalorder %s1813_s10, %s2076_s2 }
  0x4b   :  { %p1819_p6 = pnand %p1817_p5, %p1814_p4 }
  0x4d   :  { %1822 = shalt.err (!%p1819_p6)
}
  0x4e   :  { %s1823_s0 = scalar_lea.vmem %s46_s27, 32  ;;  %p1828_p8 = scmp.lt.s32.totalorder %s46_s27, %s46_s27 }
  0x4f   :  { %p1824_p7 = scmp.ne.s32.totalorder %s46_s27, %s1823_s0  ;;  %p1829_p9 = scmp.lt.s32.totalorder %s1823_s0, %s1823_s0 }
  0x51   :  { %p1830_p10 = por %p1829_p9, %p1828_p8 }
  0x53   :  { %p1831_p11 = pnand %p1830_p10, %p1824_p7 }
  0x55   :  { %1834 = shalt.err (!%p1831_p11)
}
  0x56   :  { %48 = dma.hbm_to_vmem [thread:$0]  %s2076_s2, 32, %s46_s27, [#allocation6]  }
  0x57   :  { %s1835_s17 = scalar_lea.hbm %s2078_s4, 16 }
  0x58   :  { %p1836_p12 = scmp.ne.s32.totalorder %s2078_s4, %s1835_s17  ;;  %p1839_p13 = scmp.lt.u32.totalorder %s1835_s17, %s2078_s4 }
  0x5a   :  { %p1841_p0 = pnand %p1839_p13, %p1836_p12 }
  0x5c   :  { %1844 = shalt.err (!%p1841_p0)
}
  0x5d   :  { %s1845_s22 = scalar_lea.vmem %s68_s29, 16  ;;  %s1849_s23 = scalar_lea.vmem %s68_s29, 32 }
  0x5e   :  { %p1846_p1 = scmp.ne.s32.totalorder %s68_s29, %s1845_s22  ;;  %p1850_p2 = scmp.lt.s32.totalorder %s68_s29, %s68_s29 }
  0x5f   :  { %p1851_p3 = scmp.lt.s32.totalorder %s1849_s23, %s1845_s22 }
  0x61   :  { %p1852_p4 = por %p1851_p3, %p1850_p2 }
  0x63   :  { %p1853_p5 = pnand %p1852_p4, %p1846_p1 }
  0x65   :  { %1856 = shalt.err (!%p1853_p5)
}
  0x66   :  { %70 = dma.hbm_to_vmem [thread:$0]  %s2078_s4, 16, %s68_s29, [#allocation9]  }
  0x67   :  { %s1921_s26 = smov [#allocation13]   ;;  %s1857_s27 = scalar_lea.hbm %s2080_s6, 16 }
  0x68   :  { %s89_s5 = sshll.u32 %s1921_s26, 4  ;;  %p1858_p6 = scmp.ne.s32.totalorder %s2080_s6, %s1857_s27  ;;  %s90_s5 = int_to_ptr.vmem [resolvable:$true] %s89_s5 }
  0x69   :  { %p1861_p7 = scmp.lt.u32.totalorder %s1857_s27, %s2080_s6 }
  0x6b   :  { %p1863_p8 = pnand %p1861_p7, %p1858_p6 }
  0x6d   :  { %1866 = shalt.err (!%p1863_p8)
}
  0x6e   :  { %s1867_s11 = scalar_lea.vmem %s90_s5, 16  ;;  %s1871_s4 = scalar_lea.vmem %s90_s5, 32 }
  0x6f   :  { %p1868_p9 = scmp.ne.s32.totalorder %s90_s5, %s1867_s11  ;;  %p1872_p10 = scmp.lt.s32.totalorder %s90_s5, %s90_s5 }
  0x70   :  { %p1873_p11 = scmp.lt.s32.totalorder %s1871_s4, %s1867_s11 }
  0x72   :  { %p1874_p12 = por %p1873_p11, %p1872_p10 }
  0x74   :  { %p1875_p13 = pnand %p1874_p12, %p1868_p9 }
  0x76   :  { %1878 = shalt.err (!%p1875_p13)
}
  0x77   :  { %92 = dma.hbm_to_vmem [thread:$0]  %s2080_s6, 16, %s90_s5, [#allocation12]  }
  0x78   :  { %1901 = dma.done.wait [#allocation3], 448  }
  0x79   :  { %1902 = vsyncadd [#allocation3], 4294966848 }
  0x7a   :  { %1903 = dma.done.wait [#allocation6], 14368  }
  0x7b   :  { %1904 = vsyncadd [#allocation6], 4294952928 }
  0x7c   :  { %1905 = dma.done.wait [#allocation9], 2064  }
  0x7d   :  { %1906 = vsyncadd [#allocation9], 4294965232 }
  0x7e   :  { %1907 = dma.done.wait [#allocation12], 1040  }
  0x7f   :  { %1908 = vsyncadd [#allocation12], 4294966256  ;;  %v1526_v0 = vld [vmem:[#allocation5 + $0x104] ss:$8 sps:$4 sm:$0xff]   ;;  %v1528_v1 = vld [vmem:[#allocation5 + $0x100] ss:$8 sps:$4 sm:$0xff]  }
  0x80   :  { %869 = vmatprep.subr.bf16.mxu0 %v1526_v0  ;;  %v1529_v2 = vld [vmem:[#allocation5 + $0x114] ss:$8 sps:$4 sm:$0xff]   ;;  %v1531_v3 = vld [vmem:[#allocation5 + $0x110] ss:$8 sps:$4 sm:$0xff]   ;;  %v1532_v4 = vld [vmem:[#allocation5 + $0x124] ss:$8 sps:$4 sm:$0xff]  }
  0x81   :  { %870 = vmatpush1.bf16.msra.mxu0 %v1528_v1  ;;  %v1534_v5 = vld [vmem:[#allocation5 + $0x120] ss:$8 sps:$4 sm:$0xff]   ;;  %v1535_v6 = vld [vmem:[#allocation5 + $0x134] ss:$8 sps:$4 sm:$0xff]   ;;  %v1537_v7 = vld [vmem:[#allocation5 + $0x130] ss:$8 sps:$4 sm:$0xff]  }
  0x82   :  { %871 = vmatprep.subr.bf16.mxu0 %v1529_v2  ;;  %v1538_v8 = vld [vmem:[#allocation5 + $0x144] ss:$8 sps:$4 sm:$0xff]   ;;  %v1540_v9 = vld [vmem:[#allocation5 + $0x140] ss:$8 sps:$4 sm:$0xff]   ;;  %v1541_v10 = vld [vmem:[#allocation5 + $0x154] ss:$8 sps:$4 sm:$0xff]  }
  0x83   :  { %v1543_v11 = vld [vmem:[#allocation5 + $0x150] ss:$8 sps:$4 sm:$0xff]   ;;  %v1544_v12 = vld [vmem:[#allocation5 + $0x164] ss:$8 sps:$4 sm:$0xff]   ;;  %v1546_v15 = vld [vmem:[#allocation5 + $0x160] ss:$8 sps:$4 sm:$0xff]  }
  0x84   :  { %v2050_v13 = vld [vmem:[#allocation2 + $0x8] sm:$0xff]  ;;  %v1547_v16 = vld [vmem:[#allocation5 + $0x174] ss:$8 sps:$4 sm:$0xff]   ;;  %v1552_v19 = vld [vmem:[#allocation5 + $0x180] ss:$8 sps:$4 sm:$0xff]   ;;  %vm1924_vm0 = vmmov 0  }
  0x85   :  { %872 = vmatpush1.bf16.msra.mxu0 %v1531_v3  ;;  %v1306_v14 = vcombine.high %v2050_v13, %v2050_v13  ;;  %v1549_v17 = vld [vmem:[#allocation5 + $0x170] ss:$8 sps:$4 sm:$0xff]   ;;  %v1550_v18 = vld [vmem:[#allocation5 + $0x184] ss:$8 sps:$4 sm:$0xff]   ;;  %v1553_v20 = vld [vmem:[#allocation5 + $0x194] ss:$8 sps:$4 sm:$0xff]   ;;  %v1305_v54 = vcombine.low %v2050_v13, %v2050_v13 }
  0x86   :  { %873 = vmatprep.subr.bf16.mxu0 %v1532_v4  ;;  %v1597_v21 = vld [vmem:[#allocation5 + $0x4] ss:$8 sps:$4 sm:$0xff]   ;;  %v1599_v22 = vld [vmem:[#allocation5] ss:$8 sps:$4 sm:$0xff]   ;;  %v1603_v23 = vld [vmem:[#allocation5 + $0x14] ss:$8 sps:$4 sm:$0xff]  }
  0x87   :  { %901 = vmatprep.mubr.bf16.mxu0 %v1306_v14  ;;  %828 = vmatprep.subr.bf16.mxu1 %v1597_v21  ;;  %v1605_v24 = vld [vmem:[#allocation5 + $0x10] ss:$8 sps:$4 sm:$0xff]   ;;  %v1556_v26 = vld [vmem:[#allocation5 + $0x1a4] ss:$8 sps:$4 sm:$0xff]   ;;  %v1558_v28 = vld [vmem:[#allocation5 + $0x1a0] ss:$8 sps:$4 sm:$0xff]  }
  0x88   :  { %829 = vmatpush1.bf16.msra.mxu1 %v1599_v22  ;;  %v1555_v25 = vld [vmem:[#allocation5 + $0x190] ss:$8 sps:$4 sm:$0xff]   ;;  %v1609_v27 = vld [vmem:[#allocation5 + $0x24] ss:$8 sps:$4 sm:$0xff]   ;;  %v1611_v29 = vld [vmem:[#allocation5 + $0x20] ss:$8 sps:$4 sm:$0xff]  }
  0x89   :  { %874 = vmatpush1.bf16.msra.mxu0 %v1534_v5  ;;  %830 = vmatprep.subr.bf16.mxu1 %v1603_v23  ;;  %v1615_v30 = vld [vmem:[#allocation5 + $0x34] ss:$8 sps:$4 sm:$0xff]   ;;  %v1561_v32 = vld [vmem:[#allocation5 + $0x1b0] ss:$8 sps:$4 sm:$0xff]   ;;  %v1621_v34 = vld [vmem:[#allocation5 + $0x44] ss:$8 sps:$4 sm:$0xff]  }
  0x8a   :  { %875 = vmatprep.subr.bf16.mxu0 %v1535_v6  ;;  %v1559_v31 = vld [vmem:[#allocation5 + $0x1b4] ss:$8 sps:$4 sm:$0xff]   ;;  %v1617_v33 = vld [vmem:[#allocation5 + $0x30] ss:$8 sps:$4 sm:$0xff]   ;;  %v1562_v35 = vld [vmem:[#allocation5 + $0x1c4] ss:$8 sps:$4 sm:$0xff]  }
  0x8b   :  { %v1564_v36 = vld [vmem:[#allocation5 + $0x1c0] ss:$8 sps:$4 sm:$0xff]   ;;  %v1627_v38 = vld [vmem:[#allocation5 + $0x54] ss:$8 sps:$4 sm:$0xff]   ;;  %v1567_v40 = vld [vmem:[#allocation5 + $0x1d0] ss:$8 sps:$4 sm:$0xff]  }
  0x8c   :  { %831 = vmatpush1.bf16.msra.mxu1 %v1605_v24  ;;  %v1623_v37 = vld [vmem:[#allocation5 + $0x40] ss:$8 sps:$4 sm:$0xff]   ;;  %v1565_v39 = vld [vmem:[#allocation5 + $0x1d4] ss:$8 sps:$4 sm:$0xff]   ;;  %v1629_v41 = vld [vmem:[#allocation5 + $0x50] ss:$8 sps:$4 sm:$0xff]  }
  0x8d   :  { %876 = vmatpush1.bf16.msra.mxu0 %v1537_v7  ;;  %832 = vmatprep.subr.bf16.mxu1 %v1609_v27  ;;  %v1633_v42 = vld [vmem:[#allocation5 + $0x64] ss:$8 sps:$4 sm:$0xff]   ;;  %v1570_v44 = vld [vmem:[#allocation5 + $0x1e0] ss:$8 sps:$4 sm:$0xff]   ;;  %v1639_v46 = vld [vmem:[#allocation5 + $0x74] ss:$8 sps:$4 sm:$0xff]  }
  0x8e   :  { %877 = vmatprep.subr.bf16.mxu0 %v1538_v8  ;;  %v1568_v43 = vld [vmem:[#allocation5 + $0x1e4] ss:$8 sps:$4 sm:$0xff]   ;;  %v1635_v45 = vld [vmem:[#allocation5 + $0x60] ss:$8 sps:$4 sm:$0xff]   ;;  %v1571_v47 = vld [vmem:[#allocation5 + $0x1f4] ss:$8 sps:$4 sm:$0xff]  }
  0x8f   :  { %v1573_v48 = vld [vmem:[#allocation5 + $0x1f0] ss:$8 sps:$4 sm:$0xff]   ;;  %v1645_v50 = vld [vmem:[#allocation5 + $0x84] ss:$8 sps:$4 sm:$0xff]   ;;  %v1576_v52 = vld [vmem:[#allocation5 + $0x200] ss:$8 sps:$4 sm:$0xff]  }
  0x90   :  { %833 = vmatpush1.bf16.msra.mxu1 %v1611_v29  ;;  %v1641_v49 = vld [vmem:[#allocation5 + $0x70] ss:$8 sps:$4 sm:$0xff]   ;;  %v1578_v51 = vld [vmem:[#allocation5 + $0x204] ss:$8 sps:$4 sm:$0xff]   ;;  %v1647_v55 = vld [vmem:[#allocation5 + $0x80] ss:$8 sps:$4 sm:$0xff]  }
  0x91   :  { %878 = vmatpush1.bf16.msra.mxu0 %v1540_v9  ;;  %834 = vmatprep.subr.bf16.mxu1 %v1615_v30  ;;  %v2054_v53 = vld [vmem:[#allocation2 + $0x10] sm:$0xff]  ;;  %v1659_v61 = vld [vmem:[#allocation5 + $0xa4] ss:$8 sps:$4 sm:$0xff]   ;;  %v1582_v63 = vld [vmem:[#allocation5 + $0x220] ss:$8 sps:$4 sm:$0xff]   ;;  %s1925_s6 = smov [#allocation14]  }
  0x92   :  { %879 = vmatprep.subr.bf16.mxu0 %v1541_v10  ;;  %v1651_v56 = vld [vmem:[#allocation5 + $0x94] ss:$8 sps:$4 sm:$0xff]   ;;  %v1308_v58 = vcombine.high %v2054_v53, %v2054_v53  ;;  %v1579_v59 = vld [vmem:[#allocation5 + $0x210] ss:$8 sps:$4 sm:$0xff]   ;;  %v1584_v62 = vld [vmem:[#allocation5 + $0x224] ss:$8 sps:$4 sm:$0xff]  }
  0x93   :  { %v1581_v57 = vld [vmem:[#allocation5 + $0x214] ss:$8 sps:$4 sm:$0xff]   ;;  %v1653_v60 = vld [vmem:[#allocation5 + $0x90] ss:$8 sps:$4 sm:$0xff]   ;;  %v1661_v0 = vld [vmem:[#allocation5 + $0xa0] ss:$8 sps:$4 sm:$0xff]  }
  0x94   :  { %835 = vmatpush1.bf16.msra.mxu1 %v1617_v33  ;;  %v1665_v1 = vld [vmem:[#allocation5 + $0xb4] ss:$8 sps:$4 sm:$0xff]   ;;  %v1667_v3 = vld [vmem:[#allocation5 + $0xb0] ss:$8 sps:$4 sm:$0xff]   ;;  %v115_v4 = vld [vmem:[#allocation2] sm:$0xff]  ;;  %s1291_s13 = sshll.u32 %s1925_s6, 4  ;;  %s1292_s13 = int_to_ptr.vmem [resolvable:$true] %s1291_s13 }
  0x95   :  { %880 = vmatpush1.bf16.msra.mxu0 %v1543_v11  ;;  %836 = vmatprep.subr.bf16.mxu1 %v1621_v34  ;;  %v1587_v2 = vld [vmem:[#allocation5 + $0x234] ss:$8 sps:$4 sm:$0xff]   ;;  %v1585_v5 = vld [vmem:[#allocation5 + $0x230] ss:$8 sps:$4 sm:$0xff]   ;;  %v1671_v6 = vld [vmem:[#allocation5 + $0xc4] ss:$8 sps:$4 sm:$0xff]   ;;  %v1304_v7 = vcombine.high %v115_v4, %v115_v4  ;;  %v1303_v27 = vcombine.low %v115_v4, %v115_v4  ;;  %p1884_p1 = scmp.lt.s32.totalorder %s1292_s13, %s1292_s13 }
  0x96   :  { %881 = vmatprep.subr.bf16.mxu0 %v1544_v12  ;;  %v1590_v8 = vld [vmem:[#allocation5 + $0x244] ss:$8 sps:$4 sm:$0xff]   ;;  %v1588_v9 = vld [vmem:[#allocation5 + $0x240] ss:$8 sps:$4 sm:$0xff]   ;;  %v1677_v11 = vld [vmem:[#allocation5 + $0xd4] ss:$8 sps:$4 sm:$0xff]  }
  0x97   :  { %860 = vmatprep.mubr.bf16.mxu1 %v1304_v7  ;;  %v1673_v10 = vld [vmem:[#allocation5 + $0xc0] ss:$8 sps:$4 sm:$0xff]   ;;  %v1593_v12 = vld [vmem:[#allocation5 + $0x254] ss:$8 sps:$4 sm:$0xff]   ;;  %v1591_v13 = vld [vmem:[#allocation5 + $0x250] ss:$8 sps:$4 sm:$0xff]  }
  0x98   :  { %837 = vmatpush1.bf16.msra.mxu1 %v1623_v37  ;;  %v1679_v14 = vld [vmem:[#allocation5 + $0xd0] ss:$8 sps:$4 sm:$0xff]   ;;  %v1701_v23 = vld [vmem:[#allocation8 + $0x40] sm:$0xff]   ;;  %v1614_v29 = vld [vmem:[#allocation5 + $0x294] ss:$8 sps:$4 sm:$0xff]   ;;  %s1879_s14 = scalar_lea.vmem %s1292_s13, 128 }
  0x99   :  { %882 = vmatpush1.bf16.msra.mxu0 %v1546_v15  ;;  %838 = vmatprep.subr.bf16.mxu1 %v1627_v38  ;;  %v1683_v15 = vld [vmem:[#allocation5 + $0xe4] ss:$8 sps:$4 sm:$0xff]   ;;  %v1691_v21 = vld [vmem:[#allocation5 + $0xf0] ss:$8 sps:$4 sm:$0xff]   ;;  %v1626_v37 = vld [vmem:[#allocation5 + $0x2b4] ss:$8 sps:$4 sm:$0xff]   ;;  %p1880_p0 = scmp.ne.s32.totalorder %s1292_s13, %s1879_s14  ;;  %p1885_p2 = scmp.lt.s32.totalorder %s1879_s14, %s1879_s14 }
  0x9a   :  { %883 = vmatprep.subr.bf16.mxu0 %v1547_v16  ;;  %v1596_v16 = vld [vmem:[#allocation5 + $0x264] ss:$8 sps:$4 sm:$0xff]   ;;  %v1600_v22 = vld [vmem:[#allocation5 + $0x270] ss:$8 sps:$4 sm:$0xff]   ;;  %v1700_v4 = vld [vmem:[#allocation2 + $0x18] ss:$0 sps:$4 sm:$0xff]  }
  0x9b   :  { %v1608_v24 = vld [vmem:[#allocation5 + $0x284] ss:$8 sps:$4 sm:$0xff]   ;;  %v1706_v34 = vld [vmem:[#allocation8 + $0x10] sm:$0xff]   ;;  %v1708_v38 = vld [vmem:[#allocation8 + $0x18] sm:$0xff]   ;;  %p1886_p3 = por %p1885_p2, %p1884_p1 }
  0x9c   :  { %839 = vmatpush1.bf16.msra.mxu1 %v1629_v41  ;;  %v1704_v30 = vld [vmem:[#allocation8 + $0x8] sm:$0xff]   ;;  %v1713_v7 = vld [vmem:[#allocation8 + $0x70] sm:$0xff]  }
  0x9d   :  { %884 = vmatpush1.bf16.msra.mxu0 %v1549_v17  ;;  %840 = vmatprep.subr.bf16.mxu1 %v1633_v42  ;;  %v1594_v17 = vld [vmem:[#allocation5 + $0x260] ss:$8 sps:$4 sm:$0xff]   ;;  %v1620_v33 = vld [vmem:[#allocation5 + $0x2a4] ss:$8 sps:$4 sm:$0xff]   ;;  %p1887_p4 = pnand %p1886_p3, %p1880_p0 }
  0x9e   :  { %885 = vmatprep.subr.bf16.mxu0 %v1550_v18  ;;  %v1602_v18 = vld [vmem:[#allocation5 + $0x274] ss:$8 sps:$4 sm:$0xff]   ;;  %v1632_v41 = vld [vmem:[#allocation5 + $0x2c4] ss:$8 sps:$4 sm:$0xff]  }
  0x9f   :  { %v1710_v42 = vld [vmem:[#allocation8 + $0x20] sm:$0xff]  }
  0xa0   :  { %841 = vmatpush1.bf16.msra.mxu1 %v1635_v45  ;;  %v1636_v45 = vld [vmem:[#allocation5 + $0x2d0] ss:$8 sps:$4 sm:$0xff]  }
  0xa1   :  { %886 = vmatpush1.bf16.msra.mxu0 %v1552_v19  ;;  %842 = vmatprep.subr.bf16.mxu1 %v1639_v46  ;;  %v1685_v19 = vld [vmem:[#allocation5 + $0xe0] ss:$8 sps:$4 sm:$0xff]   ;;  %v1644_v46 = vld [vmem:[#allocation5 + $0x2e4] ss:$8 sps:$4 sm:$0xff]  }
  0xa2   :  { %887 = vmatprep.subr.bf16.mxu0 %v1553_v20  ;;  %v1689_v20 = vld [vmem:[#allocation5 + $0xf4] ss:$8 sps:$4 sm:$0xff]  }
  0xa4   :  { %843 = vmatpush1.bf16.msra.mxu1 %v1641_v49  ;;  %v1648_v49 = vld [vmem:[#allocation5 + $0x2f0] ss:$8 sps:$4 sm:$0xff]  }
  0xa5   :  { %888 = vmatpush1.bf16.msra.mxu0 %v1555_v25  ;;  %844 = vmatprep.subr.bf16.mxu1 %v1645_v50  ;;  %v1702_v25 = vld [vmem:[#allocation8] sm:$0xff]  }
  0xa6   :  { %889 = vmatprep.subr.bf16.mxu0 %v1556_v26  ;;  %v1606_v26 = vld [vmem:[#allocation5 + $0x280] ss:$8 sps:$4 sm:$0xff]   ;;  %v1658_v50 = vld [vmem:[#allocation5 + $0x304] ss:$8 sps:$4 sm:$0xff]  }
  0xa8   :  { %845 = vmatpush1.bf16.msra.mxu1 %v1647_v55  ;;  %v1662_v55 = vld [vmem:[#allocation5 + $0x310] ss:$8 sps:$4 sm:$0xff]  }
  0xa9   :  { %890 = vmatpush1.bf16.msra.mxu0 %v1558_v28  ;;  %846 = vmatprep.subr.bf16.mxu1 %v1651_v56  ;;  %v1703_v28 = vld [vmem:[#allocation8 + $0x48] sm:$0xff]   ;;  %v1922_v56 = vmov 0  }
  0xaa   :  { %891 = vmatprep.subr.bf16.mxu0 %v1559_v31  ;;  %v1612_v31 = vld [vmem:[#allocation5 + $0x290] ss:$8 sps:$4 sm:$0xff]  }
  0xac   :  { %847 = vmatpush1.bf16.msra.mxu1 %v1653_v60  ;;  %v1674_v60 = vld [vmem:[#allocation5 + $0x330] ss:$8 sps:$4 sm:$0xff]  }
  0xad   :  { %892 = vmatpush1.bf16.msra.mxu0 %v1561_v32  ;;  %848 = vmatprep.subr.bf16.mxu1 %v1659_v61  ;;  %v1705_v32 = vld [vmem:[#allocation8 + $0x50] sm:$0xff]   ;;  %v1682_v61 = vld [vmem:[#allocation5 + $0x344] ss:$8 sps:$4 sm:$0xff]  }
  0xae   :  { %893 = vmatprep.subr.bf16.mxu0 %v1562_v35  ;;  %v1618_v35 = vld [vmem:[#allocation5 + $0x2a0] ss:$8 sps:$4 sm:$0xff]  }
  0xb0   :  { %849 = vmatpush1.bf16.msra.mxu1 %v1661_v0  ;;  %v1694_v0 = vld [vmem:[#allocation5 + $0x364] ss:$8 sps:$4 sm:$0xff]  }
  0xb1   :  { %894 = vmatpush1.bf16.msra.mxu0 %v1564_v36  ;;  %850 = vmatprep.subr.bf16.mxu1 %v1665_v1  ;;  %v1707_v36 = vld [vmem:[#allocation8 + $0x58] sm:$0xff]  }
  0xb2   :  { %895 = vmatprep.subr.bf16.mxu0 %v1565_v39  ;;  %v1624_v39 = vld [vmem:[#allocation5 + $0x2b0] ss:$8 sps:$4 sm:$0xff]   ;;  %v1692_v1 = vld [vmem:[#allocation5 + $0x360] ss:$8 sps:$4 sm:$0xff]  }
  0xb4   :  { %851 = vmatpush1.bf16.msra.mxu1 %v1667_v3  ;;  %v1697_v3 = vld [vmem:[#allocation5 + $0x370] ss:$8 sps:$4 sm:$0xff]  }
  0xb5   :  { %896 = vmatpush1.bf16.msra.mxu0 %v1567_v40  ;;  %852 = vmatprep.subr.bf16.mxu1 %v1671_v6  ;;  %v1709_v40 = vld [vmem:[#allocation8 + $0x60] sm:$0xff]   ;;  %v1712_v6 = vld [vmem:[#allocation8 + $0x28] sm:$0xff]  }
  0xb6   :  { %897 = vmatprep.subr.bf16.mxu0 %v1568_v43  ;;  %v1630_v43 = vld [vmem:[#allocation5 + $0x2c0] ss:$8 sps:$4 sm:$0xff]  }
  0xb8   :  { %853 = vmatpush1.bf16.msra.mxu1 %v1673_v10  ;;  %v1716_v10 = vld [vmem:[#allocation8 + $0x38] sm:$0xff]  }
  0xb9   :  { %898 = vmatpush1.bf16.msra.mxu0 %v1570_v44  ;;  %854 = vmatprep.subr.bf16.mxu1 %v1677_v11  ;;  %v1638_v44 = vld [vmem:[#allocation5 + $0x2d4] ss:$8 sps:$4 sm:$0xff]   ;;  %v1923_v11 = vmov 0.0  }
  0xba   :  { %899 = vmatprep.subr.bf16.mxu0 %v1571_v47  ;;  %v1642_v47 = vld [vmem:[#allocation5 + $0x2e0] ss:$8 sps:$4 sm:$0xff]  }
  0xbc   :  { %855 = vmatpush1.bf16.msra.mxu1 %v1679_v14 }
  0xbd   :  { %900 = vmatpush1.bf16.msra.mxu0 %v1573_v48  ;;  %856 = vmatprep.subr.bf16.mxu1 %v1683_v15  ;;  %v1650_v48 = vld [vmem:[#allocation5 + $0x2f4] ss:$8 sps:$4 sm:$0xff]  }
  0xbe   :  { %910 = vmatprep.subr.bf16.mxu0 %v1578_v51  ;;  %v1307_v51 = vcombine.low %v2054_v53, %v2054_v53  ;;  %v1680_v53 = vld [vmem:[#allocation5 + $0x340] ss:$8 sps:$4 sm:$0xff]  }
  0xc0   :  { %902 = vmatmul.mubr.bf16.vlgmr.msra.gmra.mrb[0].mxu0 %v1305_v54  ;;  %857 = vmatpush1.bf16.msra.mxu1 %v1685_v19  ;;  %v1664_v54 = vld [vmem:[#allocation5 + $0x314] ss:$8 sps:$4 sm:$0xff]   ;;  %v231_v19 = vld [vmem:[#allocation7] sm:$0x3] }
  0xc1   :  { %911 = vmatpush1.bf16.msra.mxu0 %v1576_v52  ;;  %942 = vmatprep.mubr.bf16.mxu0 %v1308_v58  ;;  %v1656_v52 = vld [vmem:[#allocation5 + $0x300] ss:$8 sps:$4 sm:$0xff]  }
  0xc2   :  { %912 = vmatprep.subr.bf16.mxu0 %v1581_v57  ;;  %858 = vmatprep.subr.bf16.mxu1 %v1689_v20  ;;  %v1670_v57 = vld [vmem:[#allocation5 + $0x324] ss:$8 sps:$4 sm:$0xff]   ;;  %v1668_v58 = vld [vmem:[#allocation5 + $0x320] ss:$8 sps:$4 sm:$0xff]  }
  0xc4   :  { %859 = vmatpush1.bf16.msra.mxu1 %v1691_v21 }
  0xc5   :  { %913 = vmatpush1.bf16.msra.mxu0 %v1579_v59  ;;  %1448 = vmatprep.subr.bf16.mxu1 %v1701_v23  ;;  %v1676_v59 = vld [vmem:[#allocation5 + $0x334] ss:$8 sps:$4 sm:$0xff]  }
  0xc6   :  { %914 = vmatprep.subr.bf16.mxu0 %v1584_v62  ;;  %v1688_v62 = vld [vmem:[#allocation5 + $0x354] ss:$8 sps:$4 sm:$0xff]  }
  0xc7   :  { %861 = vmatmul.mubr.bf16.vlgmr.msra.gmra.mrb[0].mxu1 %v1303_v27 }
  0xc8   :  { %1449 = vmatpush3.bf16.msra.mxu1 %v1702_v25 }
  0xc9   :  { %915 = vmatpush1.bf16.msra.mxu0 %v1582_v63  ;;  %1450 = vmatprep.subr.bf16.mxu1 %v1703_v28  ;;  %v1686_v63 = vld [vmem:[#allocation5 + $0x350] ss:$8 sps:$4 sm:$0xff]  }
  0xca   :  { %916 = vmatprep.subr.bf16.mxu0 %v1587_v2  ;;  %v1699_v2 = vld [vmem:[#allocation5 + $0x374] ss:$8 sps:$4 sm:$0xff]  }
  0xcc   :  { %1451 = vmatpush3.bf16.msra.mxu1 %v1704_v30 }
  0xcd   :  { %917 = vmatpush1.bf16.msra.mxu0 %v1585_v5  ;;  %1452 = vmatprep.subr.bf16.mxu1 %v1705_v32  ;;  %v1711_v5 = vld [vmem:[#allocation8 + $0x68] sm:$0xff]  }
  0xce   :  { %918 = vmatprep.subr.bf16.mxu0 %v1590_v8  ;;  %v1714_v8 = vld [vmem:[#allocation8 + $0x30] sm:$0xff]  }
  0xd0   :  { %1453 = vmatpush3.bf16.msra.mxu1 %v1706_v34  ;;  %v1717_v34 = vld [vmem:[#allocation11] sm:$0xff]  }
  0xd1   :  { %919 = vmatpush1.bf16.msra.mxu0 %v1588_v9  ;;  %1454 = vmatprep.subr.bf16.mxu1 %v1707_v36  ;;  %v1715_v9 = vld [vmem:[#allocation8 + $0x78] sm:$0xff]   ;;  %v1718_v36 = vld [vmem:[#allocation11 + $0x8] sm:$0xff]  }
  0xd2   :  { %920 = vmatprep.subr.bf16.mxu0 %v1593_v12 }
  0xd4   :  { %1455 = vmatpush3.bf16.msra.mxu1 %v1708_v38  ;;  %v1720_v38 = vld [vmem:[#allocation11 + $0x18] sm:$0xff]  }
  0xd5   :  { %921 = vmatpush1.bf16.msra.mxu0 %v1591_v13  ;;  %1456 = vmatprep.subr.bf16.mxu1 %v1709_v40  ;;  %v1722_v40 = vld [vmem:[#allocation11 + $0x28] sm:$0xff]  }
  0xd6   :  { %922 = vmatprep.subr.bf16.mxu0 %v1596_v16  ;;  %v233_v16 = vlaneseq }
  0xd8   :  { %1457 = vmatpush3.bf16.msra.mxu1 %v1710_v42  ;;  %v1724_v42 = vld [vmem:[#allocation11 + $0x38] sm:$0xff]  }
  0xd9   :  { %923 = vmatpush1.bf16.msra.mxu0 %v1594_v17  ;;  %1458 = vmatprep.subr.bf16.mxu1 %v1711_v5  ;;  %v234_v17 = vshrl.u32 %v233_v16, 7 }
  0xda   :  { %924 = vmatprep.subr.bf16.mxu0 %v1602_v18 }
  0xdb   :  { %v235_v18 = vsub.s32 0, %v234_v17  ;;  %v239_v20 = vsub.s32 1, %v234_v17 }
  0xdc   :  { %1459 = vmatpush3.bf16.msra.mxu1 %v1712_v6 }
  0xdd   :  { %925 = vmatpush1.bf16.msra.mxu0 %v1600_v22  ;;  %1460 = vmatprep.subr.bf16.mxu1 %v1713_v7  ;;  %v236_v21 = vrot.slane %v231_v19, %v235_v18  ;;  %v240_v22 = vrot.slane %v231_v19, %v239_v20 }
  0xde   :  { %926 = vmatprep.subr.bf16.mxu0 %v1608_v24 }
  0xe0   :  { %1461 = vmatpush3.bf16.msra.mxu1 %v1714_v8 }
  0xe1   :  { %927 = vmatpush1.bf16.msra.mxu0 %v1606_v26  ;;  %1462 = vmatprep.subr.bf16.mxu1 %v1715_v9 }
  0xe2   :  { %928 = vmatprep.subr.bf16.mxu0 %v1614_v29 }
  0xe4   :  { %1463 = vmatpush3.bf16.msra.mxu1 %v1716_v10 }
  0xe5   :  { %929 = vmatpush1.bf16.msra.mxu0 %v1612_v31  ;;  %1479 = vmatprep.subr.bf16.mxu1 %v1923_v11 }
  0xe6   :  { %930 = vmatprep.subr.bf16.mxu0 %v1620_v33 }
  0xe9   :  { %931 = vmatpush1.bf16.msra.mxu0 %v1618_v35 }
  0xea   :  { %932 = vmatprep.subr.bf16.mxu0 %v1626_v37  ;;  %v1719_v37 = vld [vmem:[#allocation11 + $0x10] sm:$0xff]  }
  0xed   :  { %933 = vmatpush1.bf16.msra.mxu0 %v1624_v39  ;;  %v1721_v39 = vld [vmem:[#allocation11 + $0x20] sm:$0xff]  }
  0xee   :  { %934 = vmatprep.subr.bf16.mxu0 %v1632_v41  ;;  %v1723_v41 = vld [vmem:[#allocation11 + $0x30] sm:$0xff]  }
  0xf1   :  { %935 = vmatpush1.bf16.msra.mxu0 %v1630_v43 }
  0xf2   :  { %936 = vmatprep.subr.bf16.mxu0 %v1638_v44  ;;  %v1422_v44 = vld [vmem:[#allocation10] ss:$0 sm:$0xff] }
  0xf5   :  { %937 = vmatpush1.bf16.msra.mxu0 %v1636_v45 }
  0xf6   :  { %938 = vmatprep.subr.bf16.mxu0 %v1644_v46 }
  0xf9   :  { %939 = vmatpush1.bf16.msra.mxu0 %v1642_v47 }
  0xfa   :  { %940 = vmatprep.subr.bf16.mxu0 %v1650_v48 }
  0xfd   :  { %941 = vmatpush1.bf16.msra.mxu0 %v1648_v49 }
  0xfe   :  { %951 = vmatprep.subr.bf16.mxu0 %v1658_v50 }
 0x100   :  { %943 = vmatmul.mubr.bf16.vlgmr.msra.gmra.mrb[0].mxu0 %v1307_v51 }
 0x101   :  { %952 = vmatpush1.bf16.msra.mxu0 %v1656_v52  ;;  %983 = vmatprep.mubr.bf16.mxu0 %v1922_v56  ;;  %v1439_v52 = vld [vmem:[#allocation13] ss:$0 sm:$0xff] }
 0x102   :  { %953 = vmatprep.subr.bf16.mxu0 %v1664_v54 }
 0x105   :  { %954 = vmatpush1.bf16.msra.mxu0 %v1662_v55 }
 0x106   :  { %955 = vmatprep.subr.bf16.mxu0 %v1670_v57 }
 0x109   :  { %956 = vmatpush1.bf16.msra.mxu0 %v1668_v58 }
 0x10a   :  { %957 = vmatprep.subr.bf16.mxu0 %v1676_v59 }
 0x10d   :  { %958 = vmatpush1.bf16.msra.mxu0 %v1674_v60 }
 0x10e   :  { %959 = vmatprep.subr.bf16.mxu0 %v1682_v61 }
 0x111   :  { %960 = vmatpush1.bf16.msra.mxu0 %v1680_v53 }
 0x112   :  { %961 = vmatprep.subr.bf16.mxu0 %v1688_v62 }
 0x115   :  { %962 = vmatpush1.bf16.msra.mxu0 %v1686_v63 }
 0x116   :  { %963 = vmatprep.subr.bf16.mxu0 %v1694_v0 }
 0x119   :  { %964 = vmatpush1.bf16.msra.mxu0 %v1692_v1 }
 0x11a   :  { %965 = vmatprep.subr.bf16.mxu0 %v1699_v2 }
 0x11d   :  { %966 = vmatpush1.bf16.msra.mxu0 %v1697_v3 }
 0x120   :  { %984 = vmatmul.mubr.bf16.vlgmr.msra.gmra.mrb[0].mxu0 %v1700_v4 }
 0x19a   :  { %v862_v12 = vpop.f32.mrb[0].mxu1 }
 0x19b   :  { %v864_v13 = vpop.f32.mrb[1].mxu1  ;;  %v863_v23 = vadd.f32 %v862_v12, %v236_v21 }
 0x19c   :  { %v866_v14 = vpop.f32.mrb[2].mxu1  ;;  %v865_v24 = vadd.f32 %v864_v13, %v240_v22 }
 0x19d   :  { %v867_v15 = vpop.f32.mrb[3].mxu1 }
 0x1f3   :  { %v985_v25 = vpop.f32.mrb[0].mxu0 }
 0x1f4   :  { %v1500_v26 = vadd.f32 %v985_v25, %v863_v23  ;;  %v987_v27 = vpop.f32.mrb[1].mxu0 }
 0x1f5   :  { %v1502_v28 = vadd.f32 %v987_v27, %v865_v24  ;;  %v989_v29 = vpop.f32.mrb[2].mxu0 }
 0x1f6   :  { %v992_v30 = vmax.f32 %v1500_v26, 0.0  ;;  %v990_v31 = vpop.f32.mrb[3].mxu0 }
 0x1f7   :  { %v993_v32 = vmax.f32 %v1502_v28, 0.0 }
 0x1f8   :  { %v994_v35 = vpack.c.bf16 %v992_v30, %v992_v30 }
 0x1f9   :  { %v995_v33 = vpack.c.bf16 %v993_v32, %v993_v32 }
 0x1fb   :  { %1163 = vmatprep.mubr.bf16.mxu1 %v995_v33 }
 0x1fc   :  { %1164 = vmatmul.mubr.bf16.vlgmr.msra.gmra.mrb[4].mxu1 %v994_v35 }
 0x1fd   :  { %1480 = vmatpush3.bf16.msra.mxu1 %v1717_v34  ;;  %1495 = vmatprep.mubr.msk.bf16.mxu1 %vm1924_vm0, %v1923_v11 }
 0x1fe   :  { %1481 = vmatprep.subr.bf16.mxu1 %v1923_v11 }
 0x201   :  { %1482 = vmatpush3.bf16.msra.mxu1 %v1718_v36 }
 0x202   :  { %1483 = vmatprep.subr.bf16.mxu1 %v1923_v11 }
 0x205   :  { %1484 = vmatpush3.bf16.msra.mxu1 %v1719_v37 }
 0x206   :  { %1485 = vmatprep.subr.bf16.mxu1 %v1923_v11 }
 0x209   :  { %1486 = vmatpush3.bf16.msra.mxu1 %v1720_v38 }
 0x20a   :  { %1487 = vmatprep.subr.bf16.mxu1 %v1923_v11 }
 0x20d   :  { %1488 = vmatpush3.bf16.msra.mxu1 %v1721_v39 }
 0x20e   :  { %1489 = vmatprep.subr.bf16.mxu1 %v1923_v11 }
 0x211   :  { %1490 = vmatpush3.bf16.msra.mxu1 %v1722_v40 }
 0x212   :  { %1491 = vmatprep.subr.bf16.mxu1 %v1923_v11 }
 0x215   :  { %1492 = vmatpush3.bf16.msra.mxu1 %v1723_v41 }
 0x216   :  { %1493 = vmatprep.subr.bf16.mxu1 %v1923_v11 }
 0x219   :  { %1494 = vmatpush3.bf16.msra.mxu1 %v1724_v42 }
 0x2cf   :  { %v1464_v43 = vpop.f32.mrb[4].mxu1 }
 0x2d0   :  { %v1465_v45 = vpop.f32.mrb[5].mxu1 }
 0x2d1   :  { %v1466_v46 = vadd.f32 %v1465_v45, %v1464_v43  ;;  %v1467_v47 = vpop.f32.mrb[6].mxu1 }
 0x2d2   :  { %v1468_v48 = vpop.f32.mrb[7].mxu1 }
 0x2d3   :  { %v1166_v49 = vadd.f32 %v1466_v46, %v1422_v44 }
 0x2d5   :  { %v1171_v50 = vmax.f32 %v1166_v49, 0.0 }
 0x2d7   :  { %v1172_v51 = vpack.c.bf16 %v1171_v50, %v1171_v50 }
 0x2d9   :  { %1496 = vmatmul.mubr.bf16.vlgmr.msra.gmra.mrb[8].mxu1 %v1172_v51 }
 0x3ac   :  { %v1278_v54 = vpop.f32.mrb[8].mxu1 }
 0x3ad   :  { %v1279_v55 = vadd.f32 %v1439_v52, %v1278_v54  ;;  %v1497_v56 = vpop.f32.mrb[9].mxu1 }
 0x3ae   :  { %v1281_v57 = vpop.f32.mrb[10].mxu1 }
 0x3af   :  { %1284 = vst [vmem:[#allocation14] sm:$0xff] %v1279_v55  ;;  %v1498_v58 = vpop.f32.mrb[11].mxu1 }
 0x3b0   :  { %1890 = shalt.err (!%p1887_p4)
}
 0x3b1   :  { %s1891_s15 = scalar_lea.hbm %s2081_s7, 128 }
 0x3b2   :  { %p1892_p5 = scmp.ne.s32.totalorder %s2081_s7, %s1891_s15  ;;  %p1895_p6 = scmp.lt.u32.totalorder %s1891_s15, %s2081_s7 }
 0x3b4   :  { %p1897_p7 = pnand %p1895_p6, %p1892_p5 }
 0x3b6   :  { %1900 = shalt.err (!%p1897_p7)
}
 0x3b7   :  { %1294 = dma.vmem_to_hbm [thread:$0]  %s1292_s13, 128, %s2081_s7, [#allocation4]  }
 0x3b8   :  { %1909 = dma.done.wait [#allocation4], 128  }
 0x3b9   :  { %1910 = vsyncadd [#allocation4], 4294967168 }
 0x3ba   :  { %1298 = vsyncpa [#allocation3], 1 }
 0x3bb   :  { %1299 = vsyncpa [#allocation6], 1 }
 0x3bc   :  { %1300 = vsyncpa [#allocation9], 1 }
 0x3bd   :  { %1301 = vsyncpa [#allocation12], 1 }
 0x3be   :  { %1302 = vsyncpa [#allocation4], 1 }

</bundles_post_ra>
